<compile_context>
chip_gen: v6e
topology: v6e:2x2x1
jax: 0.10.0
libtpu: 0.0.40
codegen_flags: <defaults>
</compile_context>

<pallas_src>
import functools

import jax
import jax.numpy as jnp
from jax.experimental import pallas as pl
from jax.experimental.pallas import tpu as pltpu

_NEG_LARGE = -1e30  # additive mask value for invalid conv positions


def _fused_cnn_kernel(x_ref, w_ref, b_ref, mask_ref, o_ref, *, fw_max):
    """One grid step: TB batch rows -> (TB, O_pad) pooled features.

    x_ref    : (TB, S, E)        embedded tokens for this batch tile
    w_ref    : (fw_max*E, O_pad) all filters packed; filter f occupies columns
                                 [f*O, (f+1)*O) and rows [0, fw_f*E), zeros
                                 elsewhere
    b_ref    : (1, O_pad)        packed biases
    mask_ref : (S, O_pad)        additive mask: 0 where conv position t is
                                 valid for the filter owning that column,
                                 -1e30 otherwise
    o_ref    : (TB, O_pad)       relu(max_pool(conv)) for all filters, concat
    """
    TB, S, E = x_ref.shape
    O_pad = o_ref.shape[-1]

    x2d = x_ref[...].reshape(TB * S, E)  # (TB*S, E)

    # Build the im2col matrix once: lane block i holds rows shifted up by i
    # time steps.  Rows that would read past the end of a sequence (or spill
    # into the next batch row) only contribute to conv positions the additive
    # mask removes before the max-pool, so their content is irrelevant.
    taps = [x2d]
    for i in range(1, fw_max):
        shifted = jnp.concatenate(
            [x2d[i:, :], jnp.zeros((i, E), x2d.dtype)], axis=0)
        taps.append(shifted)
    im2col = jnp.concatenate(taps, axis=-1)  # (TB*S, fw_max*E)

    # One MXU matmul covering every filter width and every output channel.
    scores = jnp.dot(im2col, w_ref[...],
                     preferred_element_type=jnp.float32)  # (TB*S, O_pad)
    scores = scores + b_ref[...]
    scores = scores.reshape(TB, S, O_pad) + mask_ref[...][None, :, :]

    pooled = jnp.max(scores, axis=1)          # max_pool1d over the full time axis
    o_ref[...] = jnp.maximum(pooled, 0.0)     # ReLU after the pool


def fused_conv_pool_relu(x, w_packed, b_packed, mask, *, fw_max, o_total,
                         batch_tile=8):
    """x: (B, S, E) -> (B, o_total) = concat over filters of relu(maxpool(conv))."""
    B, S, E = x.shape
    K, O_pad = w_packed.shape
    assert K == fw_max * E, (K, fw_max, E)
    assert S >= fw_max, "sequence shorter than the widest filter"

    # Whole batch in one step when small; otherwise 8-row (sublane-aligned)
    # batch tiles so v7x gets >= 2 grid steps when B is large.
    TB = B if B <= batch_tile else batch_tile
    n_tiles = pl.cdiv(B, TB)
    Bp = n_tiles * TB
    if Bp != B:
        x = jnp.pad(x, ((0, Bp - B), (0, 0), (0, 0)))

    kernel = functools.partial(_fused_cnn_kernel, fw_max=fw_max)
    out = pl.pallas_call(
        kernel,
        out_shape=jax.ShapeDtypeStruct((Bp, O_pad), jnp.float32),
        grid_spec=pltpu.PrefetchScalarGridSpec(
            num_scalar_prefetch=0,
            grid=(n_tiles,),
            in_specs=[
                pl.BlockSpec((TB, S, E), lambda b: (b, 0, 0)),
                pl.BlockSpec((K, O_pad), lambda b: (0, 0)),
                pl.BlockSpec((1, O_pad), lambda b: (0, 0)),
                pl.BlockSpec((S, O_pad), lambda b: (0, 0)),
            ],
            out_specs=pl.BlockSpec((TB, O_pad), lambda b: (b, 0)),
        ),
        compiler_params=pltpu.CompilerParams(
            dimension_semantics=("parallel",)),
    )(x, w_packed, b_packed, mask)
    return out[:B, :o_total]


class CNNEncoderPallas:
    """JAX/Pallas port of CNNEncoder with an embedding input_module."""

    def __init__(self, key, vocab_size, embedding_size, filter_widths,
                 filter_outputs):
        self.embedding_size = embedding_size
        self.filter_widths = tuple(filter_widths)
        self.filter_outputs = filter_outputs
        self.fw_max = max(self.filter_widths)
        self.o_total = filter_outputs * len(self.filter_widths)
        self.o_pad = max(128, ((self.o_total + 127) // 128) * 128)

        keys = jax.random.split(key, 1 + 2 * len(self.filter_widths))
        # input_module: plain embedding table (deterministic init)
        self.embedding = jax.random.normal(
            keys[0], (vocab_size, embedding_size), jnp.float32) * 0.1

        # Per-filter params kept in torch-equivalent layout for the reference.
        self.weights = []   # (fw, E, O)  == torch Conv2d weight (O,1,fw,E) transposed
        self.biases = []    # (1, O)
        for i, fw in enumerate(self.filter_widths):
            w = jax.random.normal(
                keys[1 + 2 * i], (fw, embedding_size, filter_outputs),
                jnp.float32) * 0.1
            bb = jax.random.normal(
                keys[2 + 2 * i], (1, filter_outputs), jnp.float32) * 0.1
            self.weights.append(w)
            self.biases.append(bb)

        # Pack every filter into one (fw_max*E, O_pad) weight + (1, O_pad)
        # bias so the kernel runs a single lane-dense matmul.
        E, O = embedding_size, filter_outputs
        w_packed = jnp.zeros((self.fw_max * E, self.o_pad), jnp.float32)
        b_packed = jnp.zeros((1, self.o_pad), jnp.float32)
        for f, (fw, w, bb) in enumerate(
                zip(self.filter_widths, self.weights, self.biases)):
            w_packed = w_packed.at[:fw * E, f * O:(f + 1) * O].set(
                w.reshape(fw * E, O))
            b_packed = b_packed.at[:, f * O:(f + 1) * O].set(bb)
        self.w_packed = w_packed
        self.b_packed = b_packed

    def _valid_mask(self, S):
        """Additive (S, O_pad) mask: 0 for valid conv positions, -1e30 otherwise."""
        O = self.filter_outputs
        mask = jnp.zeros((S, self.o_pad), jnp.float32)
        t = jnp.arange(S)[:, None]
        for f, fw in enumerate(self.filter_widths):
            L = S - fw + 1                       # VALID conv output length
            col = jnp.where(t < L, 0.0, _NEG_LARGE)
            mask = mask.at[:, f * O:(f + 1) * O].set(
                jnp.broadcast_to(col, (S, O)))
        return mask

    def __call__(self, token_ids):
        # input_module([input], transpose=False): embedding lookup (glue, plain JAX)
        x = jnp.take(self.embedding, token_ids, axis=0)    # (B, S, E)
        mask = self._valid_mask(x.shape[1])
        return fused_conv_pool_relu(
            x, self.w_packed, self.b_packed, mask,
            fw_max=self.fw_max, o_total=self.o_total)       # (B, O * n_filters)


def _reference(enc, token_ids):
    """Pure-JAX reference of the same forward pass."""
    x = jnp.take(enc.embedding, token_ids, axis=0)
    outs = []
    for w, b in zip(enc.weights, enc.biases):
        fw, _, O = w.shape
        B, S, E = x.shape
        L = S - fw + 1
        conv = jnp.zeros((B, L, O), jnp.float32)
        for i in range(fw):
            conv = conv + jnp.einsum('bte,eo->bto', x[:, i:i + L, :], w[i])
        conv = conv + b[0][None, None, :]
        pooled = jnp.max(conv, axis=1)
        outs.append(jnp.maximum(pooled, 0.0))
    return jnp.concatenate(outs, axis=1) if len(outs) > 1 else outs[0]


if __name__ == "__main__":
    key = jax.random.PRNGKey(0)
    k_param, k_data = jax.random.split(key)

    B, S, E, V, O = 2, 8, 32, 50, 16
    filter_widths = (2, 3, 4)

    enc = CNNEncoderPallas(k_param, V, E, filter_widths, O)
    token_ids = jax.random.randint(k_data, (B, S), 0, V)

    out = enc(token_ids)
    out = jax.block_until_ready(out)

    ref = _reference(enc, token_ids)
    assert out.shape == (B, O * len(filter_widths)), out.shape
    assert jnp.allclose(out, ref, atol=1e-5, rtol=1e-5), "mismatch vs reference"
    print("KERNEL_OK")
</pallas_src>

<mosaic_0001>
module attributes {stable_mosaic.version = 11 : i64} {
  func.func @_fused_cnn_kernel(%arg0: i32, %arg1: memref<2x8x32xf32, #tpu.memory_space<vmem>>, %arg2: memref<128x128xf32, #tpu.memory_space<vmem>>, %arg3: memref<1x128xf32, #tpu.memory_space<vmem>>, %arg4: memref<8x128xf32, #tpu.memory_space<vmem>>, %arg5: memref<2x128xf32, #tpu.memory_space<vmem>>) attributes {dimension_semantics = [#tpu.dimension_semantics<parallel>], iteration_bounds = array<i64: 1>, scalar_prefetch = 0 : i64, scratch_operands = 0 : i64, tpu.core_type = #tpu.core_type<tc>, window_params = [{transform_indices = @transform_0, window_bounds = array<i64: 2, 8, 32>}, {pipeline_mode = #tpu.pipeline_mode<synchronous>, transform_indices = @transform_1, window_bounds = array<i64: 128, 128>}, {pipeline_mode = #tpu.pipeline_mode<synchronous>, transform_indices = @transform_2, window_bounds = array<i64: 1, 128>}, {pipeline_mode = #tpu.pipeline_mode<synchronous>, transform_indices = @transform_3, window_bounds = array<i64: 8, 128>}, {transform_indices = @transform_4, window_bounds = array<i64: 2, 128>}]} {
    %c0 = arith.constant 0 : index
    %c0_0 = arith.constant 0 : index
    %c0_1 = arith.constant 0 : index
    %0 = vector.load %arg1[%c0, %c0_0, %c0_1] : memref<2x8x32xf32, #tpu.memory_space<vmem>>, vector<2x8x32xf32>
    %1 = vector.shape_cast %0 : vector<2x8x32xf32> to vector<16x32xf32>
    %2 = vector.extract_strided_slice %1 {offsets = [1, 0], sizes = [15, 32], strides = [1, 1]} : vector<16x32xf32> to vector<15x32xf32>
    %cst = arith.constant 0.000000e+00 : f32
    %3 = vector.broadcast %cst : f32 to vector<1x32xf32>
    %4 = tpu.concatenate %2, %3 in 0 : vector<15x32xf32>, vector<1x32xf32> -> vector<16x32xf32>
    %5 = vector.extract_strided_slice %1 {offsets = [2, 0], sizes = [14, 32], strides = [1, 1]} : vector<16x32xf32> to vector<14x32xf32>
    %cst_2 = arith.constant 0.000000e+00 : f32
    %6 = vector.broadcast %cst_2 : f32 to vector<2x32xf32>
    %7 = tpu.concatenate %5, %6 in 0 : vector<14x32xf32>, vector<2x32xf32> -> vector<16x32xf32>
    %8 = vector.extract_strided_slice %1 {offsets = [3, 0], sizes = [13, 32], strides = [1, 1]} : vector<16x32xf32> to vector<13x32xf32>
    %cst_3 = arith.constant 0.000000e+00 : f32
    %9 = vector.broadcast %cst_3 : f32 to vector<3x32xf32>
    %10 = tpu.concatenate %8, %9 in 0 : vector<13x32xf32>, vector<3x32xf32> -> vector<16x32xf32>
    %11 = tpu.concatenate %1, %4, %7, %10 in 1 : vector<16x32xf32>, vector<16x32xf32>, vector<16x32xf32>, vector<16x32xf32> -> vector<16x128xf32>
    %c0_4 = arith.constant 0 : index
    %c0_5 = arith.constant 0 : index
    %12 = vector.load %arg2[%c0_4, %c0_5] : memref<128x128xf32, #tpu.memory_space<vmem>>, vector<128x128xf32>
    %cst_6 = arith.constant dense<0.000000e+00> : vector<16x128xf32>
    %13 = tpu.matmul %11, %12, %cst_6 {dimension_numbers = #tpu.dot_dimension_numbers<[1], [0], [0], [1], [0, 0, 1, 1], [], []>} : vector<16x128xf32>, vector<128x128xf32>, vector<16x128xf32> -> vector<16x128xf32>
    %c0_7 = arith.constant 0 : index
    %c0_8 = arith.constant 0 : index
    %14 = vector.load %arg3[%c0_7, %c0_8] : memref<1x128xf32, #tpu.memory_space<vmem>>, vector<1x128xf32>
    %15 = vector.broadcast %14 : vector<1x128xf32> to vector<16x128xf32>
    %16 = arith.addf %13, %15 : vector<16x128xf32>
    %17 = vector.shape_cast %16 : vector<16x128xf32> to vector<2x8x128xf32>
    %c0_9 = arith.constant 0 : index
    %c0_10 = arith.constant 0 : index
    %18 = vector.load %arg4[%c0_9, %c0_10] : memref<8x128xf32, #tpu.memory_space<vmem>>, vector<8x128xf32>
    %19 = vector.shape_cast %18 : vector<8x128xf32> to vector<1x8x128xf32>
    %20 = vector.broadcast %19 : vector<1x8x128xf32> to vector<2x8x128xf32>
    %21 = arith.addf %17, %20 : vector<2x8x128xf32>
    %cst_11 = arith.constant dense<0xFF800000> : vector<2x128xf32>
    %22 = vector.multi_reduction <maximumf>, %21, %cst_11 [1] : vector<2x8x128xf32> to vector<2x128xf32>
    %cst_12 = arith.constant 0.000000e+00 : f32
    %23 = vector.broadcast %cst_12 : f32 to vector<2x128xf32>
    %24 = arith.maximumf %22, %23 : vector<2x128xf32>
    %c0_13 = arith.constant 0 : index
    %c0_14 = arith.constant 0 : index
    %25 = vector.load %arg5[%c0_13, %c0_14] : memref<2x128xf32, #tpu.memory_space<vmem>>, vector<2x128xf32>
    tpu.vector_store %arg5[%c0_13, %c0_14], %24 {strides = array<i32>} : memref<2x128xf32, #tpu.memory_space<vmem>>, vector<2x128xf32>,
    return
  }
  func.func @transform_0(%arg0: i32) -> (i32, i32, i32) {
    %c0_i32 = arith.constant 0 : i32
    %c0_i32_0 = arith.constant 0 : i32
    %c0_i32_1 = arith.constant 0 : i32
    return %arg0, %c0_i32, %c0_i32_0 : i32, i32, i32
  }
  func.func @transform_1(%arg0: i32) -> (i32, i32) {
    %c0_i32 = arith.constant 0 : i32
    %c0_i32_0 = arith.constant 0 : i32
    %c0_i32_1 = arith.constant 0 : i32
    return %c0_i32, %c0_i32_0 : i32, i32
  }
  func.func @transform_2(%arg0: i32) -> (i32, i32) {
    %c0_i32 = arith.constant 0 : i32
    %c0_i32_0 = arith.constant 0 : i32
    %c0_i32_1 = arith.constant 0 : i32
    return %c0_i32, %c0_i32_0 : i32, i32
  }
  func.func @transform_3(%arg0: i32) -> (i32, i32) {
    %c0_i32 = arith.constant 0 : i32
    %c0_i32_0 = arith.constant 0 : i32
    %c0_i32_1 = arith.constant 0 : i32
    return %c0_i32, %c0_i32_0 : i32, i32
  }
  func.func @transform_4(%arg0: i32) -> (i32, i32) {
    %c0_i32 = arith.constant 0 : i32
    %c0_i32_0 = arith.constant 0 : i32
    return %arg0, %c0_i32 : i32, i32
  }
}

</mosaic_0001>

<bundles_post_ra>
// kernel: tpu_custom_call.1
= control target key start
LH: loop header
LB: loop body
LE: loop exit
PB: predicated region body
PF: predicated region fallthrough
CT: control target
= control target key end

     0   :  { %9 = vsyncpa [#allocation3], 0  ;;  %s475_s0 = inlined_call_operand.hbm [shape: f32[2,8,32], index: 0, kind: input, shape index: {}]   ;;  %s476_s1 = inlined_call_operand.hbm [shape: f32[128,128], index: 1, kind: input, shape index: {}]   ;;  %s477_s2 = inlined_call_operand.vmem [shape: f32[1,128], index: 2, kind: input, shape index: {}]   ;;  %s478_s3 = inlined_call_operand.hbm [shape: f32[8,128], index: 3, kind: input, shape index: {}]   ;;  %s479_s4 = inlined_call_operand.hbm [shape: f32[2,128], index: 4, kind: output, shape index: {}]  }
   0x1   :  { %10 = vsyncpa [#allocation6], 0 }
   0x2   :  { %11 = vsyncpa [#allocation4], 0  ;;  %s410_s15 = smov [#allocation5]   ;;  %s411_s17 = smov [#allocation2]  }
   0x3   :  { %s29_s16 = sshll.u32 %s410_s15, 4  ;;  %s17_s18 = sshll.u32 %s411_s17, 4  ;;  %s30_s16 = int_to_ptr.vmem [resolvable:$true] %s29_s16  ;;  %s18_s18 = int_to_ptr.vmem [resolvable:$true] %s17_s18 }
   0x4   :  { %s332_s19 = scalar_lea.vmem %s30_s16, 2048  ;;  %p337_p1 = scmp.lt.s32.totalorder %s30_s16, %s30_s16 }
   0x5   :  { %p333_p0 = scmp.ne.s32.totalorder %s30_s16, %s332_s19  ;;  %p338_p2 = scmp.lt.s32.totalorder %s332_s19, %s332_s19 }
   0x7   :  { %p339_p3 = por %p338_p2, %p337_p1 }
   0x9   :  { %p340_p4 = pnand %p339_p3, %p333_p0 }
   0xb   :  { %343 = shalt.err (!%p340_p4)
}
   0xc   :  { %s412_s20 = smov 128   ;;  %s413_s21 = smov 8  }
   0xd   :  { %35 = dma.hbm_to_vmem [thread:$0]  %s476_s1, 2048, %s30_s16, [#allocation6], %s412_s20, %s412_s20, %s413_s21  }
   0xe   :  { %s352_s24 = scalar_lea.vmem %s18_s18, 256  ;;  %p357_p6 = scmp.lt.s32.totalorder %s18_s18, %s18_s18 }
   0xf   :  { %p353_p5 = scmp.ne.s32.totalorder %s18_s18, %s352_s24  ;;  %p358_p7 = scmp.lt.s32.totalorder %s352_s24, %s352_s24 }
  0x11   :  { %p359_p8 = por %p358_p7, %p357_p6 }
  0x13   :  { %p360_p9 = pnand %p359_p8, %p353_p5 }
  0x15   :  { %363 = shalt.err (!%p360_p9)
}
  0x16   :  { %23 = dma.hbm_to_vmem [thread:$0]  %s475_s0, 256, %s18_s18, [#allocation3], %s412_s20, %s412_s20, %s413_s21  }
  0x17   :  { %s414_s27 = smov [#allocation7]  }
  0x18   :  { %s44_s28 = sshll.u32 %s414_s27, 4  ;;  %s45_s28 = int_to_ptr.vmem [resolvable:$true] %s44_s28 }
  0x19   :  { %s372_s29 = scalar_lea.vmem %s45_s28, 128  ;;  %p377_p11 = scmp.lt.s32.totalorder %s45_s28, %s45_s28 }
  0x1a   :  { %p373_p10 = scmp.ne.s32.totalorder %s45_s28, %s372_s29  ;;  %p378_p12 = scmp.lt.s32.totalorder %s372_s29, %s372_s29 }
  0x1c   :  { %p379_p13 = por %p378_p12, %p377_p11 }
  0x1e   :  { %p380_p0 = pnand %p379_p13, %p373_p10 }
  0x20   :  { %383 = shalt.err (!%p380_p0)
}
  0x21   :  { %47 = dma.hbm_to_vmem [thread:$0]  %s478_s3, 128, %s45_s28, [#allocation6]  }
  0x22   :  { %404 = dma.done.wait [#allocation3], 256  }
  0x23   :  { %405 = vsyncadd [#allocation3], 4294967040 }
  0x24   :  { %406 = dma.done.wait [#allocation6], 2176  }
  0x25   :  { %407 = vsyncadd [#allocation6], 4294965120  ;;  %v453_v0 = vld [vmem:[#allocation2] sm:$0xff]  ;;  %v455_v1 = vld [vmem:[#allocation2 + $0x8] sm:$0xff]  ;;  %vm61_vm0 = vcmask 1046528   ;;  %vm67_vm1 = vcmask 1045504  }
  0x26   :  { %vm73_vm2 = vcmask 1044480   ;;  %v124_v2 = vld [vmem:[#allocation5 + $0x78] sm:$0xff]  ;;  %v62_v3 = vrot.slane %v453_v0, 1  ;;  %v63_v4 = vrot.slane %v455_v1, 1  ;;  %v68_v5 = vrot.slane %v453_v0, 2  ;;  %v123_v7 = vld [vmem:[#allocation5 + $0x70] sm:$0xff] }
  0x27   :  { %v69_v6 = vrot.slane %v455_v1, 2  ;;  %265 = vmatprep.subr.mxu0 %v124_v2  ;;  %v74_v8 = vrot.slane %v453_v0, 3  ;;  %v75_v9 = vrot.slane %v455_v1, 3  ;;  %v122_v10 = vld [vmem:[#allocation5 + $0x68] sm:$0xff]  ;;  %v121_v18 = vld [vmem:[#allocation5 + $0x60] sm:$0xff]  ;;  %s415_s0 = smov 32  }
  0x28   :  { %266 = vmatpush3.msra.mxu0 %v124_v2  ;;  %v64_v11 = vsel %vm61_vm0, %v62_v3, %v63_v4  ;;  %v66_v12 = vsel %vm61_vm0, %v63_v4, 0.0  ;;  %v120_v21 = vld [vmem:[#allocation5 + $0x58] sm:$0xff]  ;;  %s416_s3 = smov 96   ;;  %v119_v22 = vld [vmem:[#allocation5 + $0x50] sm:$0xff]  ;;  %s417_s5 = smov 64   ;;  %v118_v23 = vld [vmem:[#allocation5 + $0x48] sm:$0xff] }
  0x29   :  { %v70_v13 = vsel %vm67_vm1, %v68_v5, %v69_v6  ;;  %v72_v14 = vsel %vm67_vm1, %v69_v6, 0.0  ;;  %267 = vmatprep.subr.mxu0 %v123_v7  ;;  %v309_v15 = vpack.i.bf16 %v66_v12, %v64_v11  ;;  %v76_v16 = vsel %vm73_vm2, %v74_v8, %v75_v9  ;;  %v117_v24 = vld [vmem:[#allocation5 + $0x40] sm:$0xff]  ;;  %v116_v25 = vld [vmem:[#allocation5 + $0x38] sm:$0xff]  ;;  %v115_v26 = vld [vmem:[#allocation5 + $0x30] sm:$0xff] }
  0x2a   :  { %v78_v17 = vsel %vm73_vm2, %v75_v9, 0.0  ;;  %268 = vmatpush3.msra.mxu0 %v123_v7  ;;  %v314_v20 = vpack.i.bf16 %v72_v14, %v70_v13  ;;  %v114_v27 = vld [vmem:[#allocation5 + $0x28] sm:$0xff]  ;;  %v113_v28 = vld [vmem:[#allocation5 + $0x20] sm:$0xff]  ;;  %v112_v29 = vld [vmem:[#allocation5 + $0x18] sm:$0xff]  ;;  %vm100_vm3 = vcmask 261120   ;;  %vm103_vm4 = vcmask 523264  }
  0x2b   :  { %v319_v19 = vpack.i.bf16 %v78_v17, %v76_v16  ;;  %269 = vmatprep.subr.mxu0 %v122_v10  ;;  %310 = vrot.lane.b32.xlu0 %v309_v15, %s415_s0  ;;  %v111_v30 = vld [vmem:[#allocation5 + $0x10] sm:$0xff]  ;;  %v110_v31 = vld [vmem:[#allocation5 + $0x8] sm:$0xff]  ;;  %v109_v32 = vld [vmem:[#allocation5] sm:$0xff]  ;;  %vm106_vm5 = vcmask 785408   ;;  %vm226_vm6 = vcmask 1041409  }
  0x2c   :  { %270 = vmatpush3.msra.mxu0 %v122_v10  ;;  %v246_v48 = vld [vmem:[%s477_s2] ss:$0 sm:$0xff]  ;;  %v207_v50 = vld [vmem:[#allocation7] sm:$0xff]  ;;  %s418_s2 = smov [#allocation8]  }
  0x2d   :  { %320 = vrot.lane.b32.xlu1 %v319_v19, %s416_s3  ;;  %271 = vmatprep.subr.mxu0 %v121_v18  ;;  %s236_s8 = sshll.u32 %s418_s2, 4  ;;  %s237_s8 = int_to_ptr.vmem [resolvable:$true] %s236_s8 }
  0x2e   :  { %272 = vmatpush3.msra.mxu0 %v121_v18  ;;  %s384_s9 = scalar_lea.vmem %s237_s8, 32  ;;  %p389_p2 = scmp.lt.s32.totalorder %s237_s8, %s237_s8 }
  0x2f   :  { %273 = vmatprep.subr.mxu0 %v120_v21  ;;  %315 = vrot.lane.b32.xlu0 %v314_v20, %s417_s5  ;;  %p385_p1 = scmp.ne.s32.totalorder %s237_s8, %s384_s9  ;;  %p390_p3 = scmp.lt.s32.totalorder %s384_s9, %s384_s9 }
  0x30   :  { %274 = vmatpush3.msra.mxu0 %v120_v21 }
  0x31   :  { %275 = vmatprep.subr.mxu0 %v119_v22  ;;  %p391_p4 = por %p390_p3, %p389_p2 }
  0x32   :  { %276 = vmatpush3.msra.mxu0 %v119_v22 }
  0x33   :  { %277 = vmatprep.subr.mxu0 %v118_v23  ;;  %p392_p5 = pnand %p391_p4, %p385_p1 }
  0x34   :  { %278 = vmatpush3.msra.mxu0 %v118_v23 }
  0x35   :  { %279 = vmatprep.subr.mxu0 %v117_v24 }
  0x36   :  { %280 = vmatpush3.msra.mxu0 %v117_v24 }
  0x37   :  { %281 = vmatprep.subr.mxu0 %v116_v25 }
  0x38   :  { %282 = vmatpush3.msra.mxu0 %v116_v25 }
  0x39   :  { %283 = vmatprep.subr.mxu0 %v115_v26 }
  0x3a   :  { %284 = vmatpush3.msra.mxu0 %v115_v26 }
  0x3b   :  { %285 = vmatprep.subr.mxu0 %v114_v27 }
  0x3c   :  { %286 = vmatpush3.msra.mxu0 %v114_v27 }
  0x3d   :  { %287 = vmatprep.subr.mxu0 %v113_v28 }
  0x3e   :  { %288 = vmatpush3.msra.mxu0 %v113_v28 }
  0x3f   :  { %289 = vmatprep.subr.mxu0 %v112_v29 }
  0x40   :  { %290 = vmatpush3.msra.mxu0 %v112_v29 }
  0x41   :  { %291 = vmatprep.subr.mxu0 %v111_v30 }
  0x42   :  { %292 = vmatpush3.msra.mxu0 %v111_v30 }
  0x43   :  { %293 = vmatprep.subr.mxu0 %v110_v31 }
  0x44   :  { %294 = vmatpush3.msra.mxu0 %v110_v31 }
  0x45   :  { %295 = vmatprep.subr.mxu0 %v109_v32 }
  0x46   :  { %296 = vmatpush3.msra.mxu0 %v109_v32 }
  0x9d   :  { %v311_v33 = vpop.permute.xlu0 %310 }
  0x9e   :  { %v313_v35 = vunpack.i.h.bf16 %v311_v33  ;;  %v312_v36 = vunpack.i.l.bf16 %v311_v33 }
  0x9f   :  { %v321_v34 = vpop.permute.xlu1 %320 }
  0xa0   :  { %v323_v38 = vunpack.i.h.bf16 %v321_v34  ;;  %v322_v39 = vunpack.i.l.bf16 %v321_v34  ;;  %v101_v42 = vsel %vm100_vm3, %v453_v0, %v312_v36  ;;  %v102_v43 = vsel %vm100_vm3, %v455_v1, %v313_v35 }
  0xa1   :  { %v316_v37 = vpop.permute.xlu0 %315 }
  0xa2   :  { %v318_v40 = vunpack.i.h.bf16 %v316_v37  ;;  %v317_v41 = vunpack.i.l.bf16 %v316_v37 }
  0xa4   :  { %v104_v44 = vsel %vm103_vm4, %v101_v42, %v317_v41  ;;  %v105_v45 = vsel %vm103_vm4, %v102_v43, %v318_v40 }
  0xa5   :  { %v107_v46 = vsel %vm106_vm5, %v104_v44, %v322_v39  ;;  %v108_v47 = vsel %vm106_vm5, %v105_v45, %v323_v38 }
  0xa6   :  { %297 = vmatprep.mubr.f32.mxu0 %v107_v46 }
  0xa7   :  { %298 = vmatmul.mubr.f32.vlgmr.msra.gmra.mxu0 %v108_v47 }
 0x167   :  { %v299_v49 = vpop.f32.mrf.mxu0 }
 0x168   :  { %v204_v51 = vadd.f32 %v299_v49, %v246_v48 }
 0x169   :  { %v198_v52 = vpop.f32.mrf.mxu0 }
 0x16a   :  { %v209_v53 = vadd.f32 %v207_v50, %v204_v51  ;;  %v199_v54 = vadd.f32 %v246_v48, %v198_v52 }
 0x16c   :  { %v216_v55 = vrot.slane %v209_v53, 4  ;;  %v208_v56 = vadd.f32 %v207_v50, %v199_v54 }
 0x16e   :  { %v217_v57 = vmax.f32 %v209_v53, %v216_v55  ;;  %v210_v58 = vrot.slane %v208_v56, 4 }
 0x170   :  { %v218_v59 = vrot.slane %v217_v57, 2  ;;  %v211_v60 = vmax.f32 %v208_v56, %v210_v58 }
 0x172   :  { %v219_v61 = vmax.f32 %v217_v57, %v218_v59  ;;  %v212_v62 = vrot.slane %v211_v60, 2 }
 0x174   :  { %v220_v63 = vrot.slane %v219_v61, 1  ;;  %v213_v0 = vmax.f32 %v211_v60, %v212_v62 }
 0x176   :  { %v214_v1 = vrot.slane %v213_v0, 1  ;;  %v221_v2 = vmax.f32 %v219_v61, %v220_v63 }
 0x178   :  { %v215_v3 = vmax.f32 %v213_v0, %v214_v1  ;;  %v223_v5 = vmax.f32 %v221_v2, 0.0 }
 0x17a   :  { %v222_v4 = vmax.f32 %v215_v3, 0.0 }
 0x17c   :  { %v227_v6 = vsel %vm226_vm6, %v223_v5, %v222_v4 }
 0x17d   :  { %229 = vst [vmem:[#allocation8] sm:$0x3] %v227_v6 }
 0x17e   :  { %395 = shalt.err (!%p392_p5)
}
 0x17f   :  { %239 = dma.vmem_to_hbm [thread:$0]  %s237_s8, 32, %s479_s4, [#allocation4]  }
 0x180   :  { %408 = dma.done.wait [#allocation4], 32  }
 0x181   :  { %409 = vsyncadd [#allocation4], 4294967264 }
 0x182   :  { %243 = vsyncpa [#allocation3], 1 }
 0x183   :  { %244 = vsyncpa [#allocation6], 1 }
 0x184   :  { %245 = vsyncpa [#allocation4], 1 }

</bundles_post_ra>
